<compile_context>
chip_gen: v5e
topology: v5e:2x2
jax: 0.10.0
libtpu: 0.0.40
codegen_flags: <defaults>
</compile_context>

<pallas_src>
import functools

import jax
import jax.numpy as jnp
from jax import lax
from jax.experimental import pallas as pl
from jax.experimental.pallas import tpu as pltpu

LANE = 128      # vreg lane width
SUBLANE = 8     # f32 sublane count


def _cdiv(a, b):
    return -(-a // b)


def _round_up(n, m):
    return ((n + m - 1) // m) * m


def mlp_kernel(x_ref, w1_ref, b1_ref, w2_ref, b2_ref, o_ref, *, o_real):
    # x : (TB, D)      f32   (cast to bf16 here, not in the wrapper)
    # w1: (D, H_pad)   bf16  | b1: (1, H_pad) f32
    # w2: (H_pad,O_pad)bf16  | b2: (1, O_pad) f32
    # o : (TB, O_pad)  bf16
    x = x_ref[...].astype(jnp.bfloat16)
    h = jnp.dot(x, w1_ref[...], preferred_element_type=jnp.float32) + b1_ref[...]
    h = jnp.maximum(h, 0.0)                                   # ReLU in f32 (VPU)
    logits = jnp.dot(h.astype(jnp.bfloat16), w2_ref[...],
                     preferred_element_type=jnp.float32) + b2_ref[...]

    # Mask the zero-padded output lanes so they don't pollute the softmax.
    lane = lax.broadcasted_iota(jnp.int32, logits.shape, dimension=1)
    logits = jnp.where(lane < o_real, logits, -jnp.inf)

    m = jnp.max(logits, axis=-1, keepdims=True)
    e = jnp.exp(logits - m)                                   # pad lanes -> 0
    denom = jnp.sum(e, axis=-1, keepdims=True)
    o_ref[...] = (e / denom).astype(o_ref.dtype)              # exact normalization


def prepare_params(w1, b1, w2, b2):
    """One-time prep: PyTorch (out,in) layout -> (in, out_pad) bf16 weights and
    (1, out_pad) f32 biases.  K of the first matmul stays at D because x is
    streamed unpadded; N dims pad to 128 lanes (lane-dense MXU/output tiles)."""
    H, D = w1.shape
    O, _ = w2.shape
    H_pad, O_pad = _round_up(H, LANE), _round_up(O, LANE)

    w1_p = jnp.zeros((D, H_pad), jnp.float32).at[:, :H].set(w1.T).astype(jnp.bfloat16)
    w2_p = jnp.zeros((H_pad, O_pad), jnp.float32).at[:H, :O].set(w2.T).astype(jnp.bfloat16)
    b1_p = jnp.zeros((1, H_pad), jnp.float32).at[0, :H].set(b1)
    b2_p = jnp.zeros((1, O_pad), jnp.float32).at[0, :O].set(b2)
    return (w1_p, b1_p, w2_p, b2_p), O


def net_forward(x, prepared, o_real, *, block_b=1024):
    """x: (B, D_in) f32. Returns softmax(fc2(relu(fc1(x)))), shape (B, o_real) f32."""
    w1_p, b1_p, w2_p, b2_p = prepared
    B, D = x.shape
    H_pad = w1_p.shape[1]
    O_pad = w2_p.shape[1]

    # Balanced batch tile: no nearly-all-padding last tile; for large batches
    # force >= 2 grid steps so both v7x TensorCores run ("parallel" axis).
    n_steps = _cdiv(B, block_b)
    if B >= 1024:
        n_steps = max(n_steps, 2)
    TB = _round_up(_cdiv(B, n_steps), SUBLANE)
    B_pad = _round_up(B, TB)

    # Only the batch axis ever needs padding (feature dim streams as-is).
    x_in = x if B_pad == B else jnp.pad(x, ((0, B_pad - B), (0, 0)))

    kernel = functools.partial(mlp_kernel, o_real=o_real)

    cost = pl.CostEstimate(
        flops=2 * B_pad * (D * H_pad + H_pad * O_pad),
        transcendentals=B_pad * O_pad,
        bytes_accessed=(B_pad * D * 4 + w1_p.size * 2 + w2_p.size * 2
                        + b1_p.size * 4 + b2_p.size * 4 + B_pad * O_pad * 2),
    )

    out = pl.pallas_call(
        kernel,
        out_shape=jax.ShapeDtypeStruct((B_pad, O_pad), jnp.bfloat16),
        grid=(B_pad // TB,),
        in_specs=[
            pl.BlockSpec((TB, D), lambda i: (i, 0)),        # x: tiled over batch, f32, unpadded D
            pl.BlockSpec((D, H_pad), lambda i: (0, 0)),     # w1: VMEM-resident
            pl.BlockSpec((1, H_pad), lambda i: (0, 0)),     # b1: VMEM-resident
            pl.BlockSpec((H_pad, O_pad), lambda i: (0, 0)), # w2: VMEM-resident
            pl.BlockSpec((1, O_pad), lambda i: (0, 0)),     # b2: VMEM-resident
        ],
        out_specs=pl.BlockSpec((TB, O_pad), lambda i: (i, 0)),
        compiler_params=pltpu.CompilerParams(
            dimension_semantics=("parallel",),              # megacore sharding on v7x
            vmem_limit_bytes=32 * 1024 * 1024,              # tiny footprint; fits every generation
        ),
        cost_estimate=cost,
    )(x_in, w1_p, b1_p, w2_p, b2_p)

    # Module semantics: (B, O) probabilities in f32.  (Downstream code that can
    # consume the padded bf16 slab directly should skip this slice.)
    return out[:B, :o_real].astype(jnp.float32)


def init_params(key, input_size, hidden_size, output_size):
    k1, k2, k3, k4 = jax.random.split(key, 4)
    lim1 = 1.0 / jnp.sqrt(input_size)
    lim2 = 1.0 / jnp.sqrt(hidden_size)
    w1 = jax.random.uniform(k1, (hidden_size, input_size), jnp.float32, -lim1, lim1)
    b1 = jax.random.uniform(k2, (hidden_size,), jnp.float32, -lim1, lim1)
    w2 = jax.random.uniform(k3, (output_size, hidden_size), jnp.float32, -lim2, lim2)
    b2 = jax.random.uniform(k4, (output_size,), jnp.float32, -lim2, lim2)
    return w1, b1, w2, b2


if __name__ == "__main__":
    input_size, hidden_size, output_size = 32, 64, 16
    batch = 8

    key = jax.random.PRNGKey(0)
    kx, kp = jax.random.split(key)
    x = jax.random.normal(kx, (batch, input_size), jnp.float32)
    w1, b1, w2, b2 = init_params(kp, input_size, hidden_size, output_size)

    prepared, o_real = prepare_params(w1, b1, w2, b2)
    out = net_forward(x, prepared, o_real)
    out = jax.block_until_ready(out)

    # Reference in plain JAX (f32). bf16 MXU operands + bf16 output store ->
    # loosened elementwise tolerance; normalization is exact up to bf16
    # quantization of the stored probabilities (<= ~2e-3 per row sum).
    h_ref = jnp.maximum(x @ w1.T + b1, 0.0)
    ref = jax.nn.softmax(h_ref @ w2.T + b2, axis=1)

    assert out.shape == (batch, output_size)
    max_err = float(jnp.max(jnp.abs(out - ref)))
    assert max_err < 3e-2, max_err
    row_sum_err = float(jnp.max(jnp.abs(jnp.sum(out, axis=1) - 1.0)))
    assert row_sum_err < 5e-3, row_sum_err

    print("KERNEL_OK")
</pallas_src>

<mosaic_0001>
module attributes {stable_mosaic.version = 11 : i64} {
  func.func @mlp_kernel(%arg0: i32, %arg1: memref<8x32xf32, #tpu.memory_space<vmem>>, %arg2: memref<32x128xbf16, #tpu.memory_space<vmem>>, %arg3: memref<1x128xf32, #tpu.memory_space<vmem>>, %arg4: memref<128x128xbf16, #tpu.memory_space<vmem>>, %arg5: memref<1x128xf32, #tpu.memory_space<vmem>>, %arg6: memref<8x128xbf16, #tpu.memory_space<vmem>>) attributes {dimension_semantics = [#tpu.dimension_semantics<parallel>], iteration_bounds = array<i64: 1>, scalar_prefetch = 0 : i64, scratch_operands = 0 : i64, tpu.core_type = #tpu.core_type<tc>, window_params = [{transform_indices = @transform_0, window_bounds = array<i64: 8, 32>}, {pipeline_mode = #tpu.pipeline_mode<synchronous>, transform_indices = @transform_1, window_bounds = array<i64: 32, 128>}, {pipeline_mode = #tpu.pipeline_mode<synchronous>, transform_indices = @transform_2, window_bounds = array<i64: 1, 128>}, {pipeline_mode = #tpu.pipeline_mode<synchronous>, transform_indices = @transform_3, window_bounds = array<i64: 128, 128>}, {pipeline_mode = #tpu.pipeline_mode<synchronous>, transform_indices = @transform_4, window_bounds = array<i64: 1, 128>}, {transform_indices = @transform_5, window_bounds = array<i64: 8, 128>}]} {
    %c0 = arith.constant 0 : index
    %c0_0 = arith.constant 0 : index
    %0 = vector.load %arg1[%c0, %c0_0] : memref<8x32xf32, #tpu.memory_space<vmem>>, vector<8x32xf32>
    %1 = arith.truncf %0 : vector<8x32xf32> to vector<8x32xbf16>
    %c0_1 = arith.constant 0 : index
    %c0_2 = arith.constant 0 : index
    %2 = vector.load %arg2[%c0_1, %c0_2] : memref<32x128xbf16, #tpu.memory_space<vmem>>, vector<32x128xbf16>
    %cst = arith.constant dense<0.000000e+00> : vector<8x128xf32>
    %3 = tpu.matmul %1, %2, %cst {dimension_numbers = #tpu.dot_dimension_numbers<[1], [0], [0], [1], [0, 0, 1, 1], [], []>} : vector<8x32xbf16>, vector<32x128xbf16>, vector<8x128xf32> -> vector<8x128xf32>
    %c0_3 = arith.constant 0 : index
    %c0_4 = arith.constant 0 : index
    %4 = vector.load %arg3[%c0_3, %c0_4] : memref<1x128xf32, #tpu.memory_space<vmem>>, vector<1x128xf32>
    %5 = vector.broadcast %4 : vector<1x128xf32> to vector<8x128xf32>
    %6 = arith.addf %3, %5 : vector<8x128xf32>
    %cst_5 = arith.constant 0.000000e+00 : f32
    %7 = vector.broadcast %cst_5 : f32 to vector<8x128xf32>
    %8 = arith.maximumf %6, %7 : vector<8x128xf32>
    %9 = arith.truncf %8 : vector<8x128xf32> to vector<8x128xbf16>
    %c0_6 = arith.constant 0 : index
    %c0_7 = arith.constant 0 : index
    %10 = vector.load %arg4[%c0_6, %c0_7] : memref<128x128xbf16, #tpu.memory_space<vmem>>, vector<128x128xbf16>
    %cst_8 = arith.constant dense<0.000000e+00> : vector<8x128xf32>
    %11 = tpu.matmul %9, %10, %cst_8 {dimension_numbers = #tpu.dot_dimension_numbers<[1], [0], [0], [1], [0, 0, 1, 1], [], []>} : vector<8x128xbf16>, vector<128x128xbf16>, vector<8x128xf32> -> vector<8x128xf32>
    %c0_9 = arith.constant 0 : index
    %c0_10 = arith.constant 0 : index
    %12 = vector.load %arg5[%c0_9, %c0_10] : memref<1x128xf32, #tpu.memory_space<vmem>>, vector<1x128xf32>
    %13 = vector.broadcast %12 : vector<1x128xf32> to vector<8x128xf32>
    %14 = arith.addf %11, %13 : vector<8x128xf32>
    %15 = tpu.iota {dimensions = array<i32: 1>} : vector<8x128xi32>
    %c16_i32 = arith.constant 16 : i32
    %16 = vector.broadcast %c16_i32 : i32 to vector<8x128xi32>
    %17 = arith.cmpi slt, %15, %16 : vector<8x128xi32>
    %cst_11 = arith.constant 0xFF800000 : f32
    %18 = vector.broadcast %cst_11 : f32 to vector<8x128xf32>
    %19 = arith.select %17, %14, %18 : vector<8x128xi1>, vector<8x128xf32>
    %cst_12 = arith.constant dense<0xFF800000> : vector<8xf32>
    %20 = vector.multi_reduction <maximumf>, %19, %cst_12 [1] : vector<8x128xf32> to vector<8xf32>
    %21 = vector.shape_cast %20 : vector<8xf32> to vector<8x1xf32>
    %22 = vector.broadcast %21 : vector<8x1xf32> to vector<8x128xf32>
    %23 = arith.subf %19, %22 : vector<8x128xf32>
    %24 = math.exp %23 : vector<8x128xf32>
    %cst_13 = arith.constant dense<0.000000e+00> : vector<8xf32>
    %25 = vector.multi_reduction <add>, %24, %cst_13 [1] : vector<8x128xf32> to vector<8xf32>
    %26 = vector.shape_cast %25 : vector<8xf32> to vector<8x1xf32>
    %27 = vector.broadcast %26 : vector<8x1xf32> to vector<8x128xf32>
    %28 = arith.divf %24, %27 : vector<8x128xf32>
    %29 = arith.truncf %28 : vector<8x128xf32> to vector<8x128xbf16>
    %c0_14 = arith.constant 0 : index
    %c0_15 = arith.constant 0 : index
    %30 = vector.load %arg6[%c0_14, %c0_15] : memref<8x128xbf16, #tpu.memory_space<vmem>>, vector<8x128xbf16>
    tpu.vector_store %arg6[%c0_14, %c0_15], %29 {strides = array<i32>} : memref<8x128xbf16, #tpu.memory_space<vmem>>, vector<8x128xbf16>,
    return
  }
  func.func @transform_0(%arg0: i32) -> (i32, i32) {
    %c0_i32 = arith.constant 0 : i32
    %c0_i32_0 = arith.constant 0 : i32
    return %arg0, %c0_i32 : i32, i32
  }
  func.func @transform_1(%arg0: i32) -> (i32, i32) {
    %c0_i32 = arith.constant 0 : i32
    %c0_i32_0 = arith.constant 0 : i32
    %c0_i32_1 = arith.constant 0 : i32
    return %c0_i32, %c0_i32_0 : i32, i32
  }
  func.func @transform_2(%arg0: i32) -> (i32, i32) {
    %c0_i32 = arith.constant 0 : i32
    %c0_i32_0 = arith.constant 0 : i32
    %c0_i32_1 = arith.constant 0 : i32
    return %c0_i32, %c0_i32_0 : i32, i32
  }
  func.func @transform_3(%arg0: i32) -> (i32, i32) {
    %c0_i32 = arith.constant 0 : i32
    %c0_i32_0 = arith.constant 0 : i32
    %c0_i32_1 = arith.constant 0 : i32
    return %c0_i32, %c0_i32_0 : i32, i32
  }
  func.func @transform_4(%arg0: i32) -> (i32, i32) {
    %c0_i32 = arith.constant 0 : i32
    %c0_i32_0 = arith.constant 0 : i32
    %c0_i32_1 = arith.constant 0 : i32
    return %c0_i32, %c0_i32_0 : i32, i32
  }
  func.func @transform_5(%arg0: i32) -> (i32, i32) {
    %c0_i32 = arith.constant 0 : i32
    %c0_i32_0 = arith.constant 0 : i32
    return %arg0, %c0_i32 : i32, i32
  }
}

</mosaic_0001>

<bundles_post_ra>
// kernel: tpu_custom_call.1
= control target key start
LH: loop header
LB: loop body
LE: loop exit
PB: predicated region body
PF: predicated region fallthrough
CT: control target
= control target key end

     0   :  { %10 = vsyncpa [#allocation3], 0  ;;  %s454_s0 = inlined_call_operand.hbm [shape: f32[8,32], index: 0, kind: input, shape index: {}]   ;;  %s455_s1 = inlined_call_operand.hbm [shape: bf16[32,128], index: 1, kind: input, shape index: {}]   ;;  %s456_s2 = inlined_call_operand.vmem [shape: f32[1,128], index: 2, kind: input, shape index: {}]   ;;  %s457_s3 = inlined_call_operand.hbm [shape: bf16[128,128], index: 3, kind: input, shape index: {}]   ;;  %s458_s4 = inlined_call_operand.vmem [shape: f32[1,128], index: 4, kind: input, shape index: {}]   ;;  %s459_s5 = inlined_call_operand.hbm [shape: bf16[8,128], index: 5, kind: output, shape index: {}]  }
   0x1   :  { %11 = vsyncpa [#allocation6], 0  ;;  %s28_s20 = sshll.u32 %s455_s1, 4  ;;  %s29_s20 = int_to_ptr.hbm [resolvable:$true] %s28_s20 }
   0x2   :  { %12 = vsyncpa [#allocation4], 0  ;;  %s400_s21 = smov [#allocation5]   ;;  %s18_s25 = sshll.u32 %s454_s0, 4  ;;  %s19_s25 = int_to_ptr.hbm [resolvable:$true] %s18_s25 }
   0x3   :  { %s30_s22 = sshll.u32 %s400_s21, 4  ;;  %s401_s26 = smov 64   ;;  %s31_s22 = int_to_ptr.vmem [resolvable:$true] %s30_s22 }
   0x4   :  { %s402_s27 = smov 4   ;;  %s403_s28 = smov [#allocation2]  }
   0x5   :  { %36 = dma.hbm_to_vmem [thread:$0]  %s29_s20, 256, %s31_s22, [#allocation6], %s401_s26, %s401_s26, %s402_s27  }
   0x6   :  { %s20_s29 = sshll.u32 %s403_s28, 4  ;;  %s43_s7 = sshll.u32 %s457_s3, 4  ;;  %s21_s29 = int_to_ptr.vmem [resolvable:$true] %s20_s29  ;;  %s44_s7 = int_to_ptr.hbm [resolvable:$true] %s43_s7 }
   0x7   :  { %23 = dma.hbm_to_vmem [thread:$0]  %s19_s25, 128, %s21_s29, [#allocation3]  }
   0x8   :  { %s404_s1 = smov [#allocation7]  }
   0x9   :  { %s45_s8 = sshll.u32 %s404_s1, 4  ;;  %s46_s8 = int_to_ptr.vmem [resolvable:$true] %s45_s8 }
   0xa   :  { %51 = dma.hbm_to_vmem [thread:$0]  %s44_s7, 1024, %s46_s8, [#allocation6], %s401_s26, %s401_s26, %s402_s27  }
   0xb   :  { %394 = dma.done.wait [#allocation3], 128  }
   0xc   :  { %395 = vsyncadd [#allocation3], 4294967168 }
   0xd   :  { %396 = dma.done.wait [#allocation6], 1280  }
   0xe   :  { %397 = vsyncadd [#allocation6], 4294966016  ;;  %v277_v0 = vld [vmem:[#allocation5 + $0x8] sm:$0xff]  ;;  %v276_v2 = vld [vmem:[#allocation5] sm:$0xff]  ;;  %vm89_vm0 = vcmask 261120   ;;  %v189_v18 = vlaneseq  ;;  %s224_s13 = sshll.u32 %s459_s5, 4  ;;  %s225_s13 = int_to_ptr.hbm [resolvable:$true] %s224_s13 }
   0xf   :  { %v285_v1 = vld [vmem:[#allocation7 + $0x38] sm:$0xff]  ;;  %99 = vmatpush.bf16.msra.mxu0 %v277_v0  ;;  %v67_v3 = vld [vmem:[#allocation2] sm:$0xff]  ;;  %v284_v4 = vld [vmem:[#allocation7 + $0x30] sm:$0xff] }
  0x10   :  { %176 = vmatpush.bf16.msra.mxu1 %v285_v1  ;;  %v68_v5 = vpack.c.bf16 %v67_v3, %v67_v3  ;;  %v283_v6 = vld [vmem:[#allocation7 + $0x28] sm:$0xff]  ;;  %v282_v7 = vld [vmem:[#allocation7 + $0x20] sm:$0xff]  ;;  %v281_v8 = vld [vmem:[#allocation7 + $0x18] sm:$0xff]  ;;  %v190_v19 = vand.u32 127, %v189_v18 }
  0x11   :  { %v280_v9 = vld [vmem:[#allocation7 + $0x10] sm:$0xff]  ;;  %v279_v10 = vld [vmem:[#allocation7 + $0x8] sm:$0xff]  ;;  %v278_v11 = vld [vmem:[#allocation7] sm:$0xff] }
  0x12   :  { %v292_v12 = vld [vmem:[%s456_s2] ss:$0 sm:$0xff]  ;;  %vm191_vm1 = vcmp.lt.s32.totalorder %v190_v19, 16  ;;  %s405_s2 = smov [#allocation8]  }
  0x13   :  { %100 = vmatpush.bf16.msra.mxu0 %v276_v2  ;;  %v293_v20 = vld [vmem:[%s458_s4] ss:$0 sm:$0xff]  ;;  %s222_s4 = sshll.u32 %s405_s2, 4  ;;  %s223_s4 = int_to_ptr.vmem [resolvable:$true] %s222_s4 }
  0x14   :  { %177 = vmatpush.bf16.msra.mxu1 %v284_v4 }
  0x16   :  { %243 = vmatmul.msk.bf16.vlgmr.msra.gmra.mxu0 %vm89_vm0, %v68_v5 }
  0x18   :  { %178 = vmatpush.bf16.msra.mxu1 %v283_v6 }
  0x1c   :  { %179 = vmatpush.bf16.msra.mxu1 %v282_v7 }
  0x20   :  { %180 = vmatpush.bf16.msra.mxu1 %v281_v8 }
  0x24   :  { %181 = vmatpush.bf16.msra.mxu1 %v280_v9 }
  0x28   :  { %182 = vmatpush.bf16.msra.mxu1 %v279_v10 }
  0x2c   :  { %183 = vmatpush.bf16.msra.mxu1 %v278_v11 }
  0x93   :  { %v102_v13 = vpop.f32.mrf.mxu0 }
  0x94   :  { %v103_v14 = vadd.f32 %v292_v12, %v102_v13 }
  0x96   :  { %v106_v15 = vmax.f32 %v103_v14, 0.0 }
  0x98   :  { %v107_v16 = vpack.c.bf16 %v106_v15, %v106_v15 }
  0x9a   :  { %184 = vmatmul.bf16.vlgmr.msra.gmra.mxu1 %v107_v16 }
  0x9b   :  { %v104_v17 = vpop.f32.mrf.mxu0 }
 0x117   :  { %v185_v21 = vpop.f32.mrf.mxu1 }
 0x118   :  { %v186_v22 = vadd.f32 %v293_v20, %v185_v21 }
 0x11a   :  { %v192_v23 = vsel %vm191_vm1, %v186_v22, -inf }
 0x11b   :  { %193 = vmax.xlane.f32.xlu0 %v192_v23 }
 0x11f   :  { %v187_v24 = vpop.f32.mrf.mxu1 }
 0x18e   :  { %v194_v25 = vpop.xlane.xlu0 %193 }
 0x18f   :  { %v195_v26 = vsub.f32 %v192_v23, %v194_v25 }
 0x191   :  { %v196_v27 = vmul.f32 1.442695, %v195_v26 }
 0x193   :  { %294 = vpow2.f32 %v196_v27 }
 0x199   :  { %v295_v28 = vpop.eup %294 }
 0x19a   :  { %198 = vadd.xlane.f32.xlu0 %v295_v28 }
 0x20d   :  { %v199_v29 = vpop.xlane.xlu0 %198 }
 0x20e   :  { %296 = vrcp.f32 %v199_v29  ;;  %v211_v33 = vand.u32 2147483648, %v199_v29  ;;  %v209_v35 = vand.u32 2147483647, %v199_v29  ;;  %vm205_vm3 = vweird.f32 %v199_v29 }
 0x210   :  { %v212_v37 = vor.u32 1.1754944e-38, %v211_v33  ;;  %vm210_vm5 = vcmp.eq.f32.partialorder %v209_v35, 8.507059e+37 }
 0x214   :  { %v297_v30 = vpop.eup %296 }
 0x215   :  { %v201_v31 = vmul.f32 %v297_v30, %v199_v29  ;;  %vm206_vm2 = vweird.f32 %v297_v30 }
 0x216   :  { %vm207_vm4 = vmor %vm205_vm3, %vm206_vm2 }
 0x217   :  { %v202_v32 = vsub.f32 1.0, %v201_v31 }
 0x219   :  { %v203_v34 = vmul.f32 %v297_v30, %v202_v32 }
 0x21b   :  { %v204_v36 = vadd.f32 %v297_v30, %v203_v34 }
 0x21d   :  { %v208_v38 = vsel %vm207_vm4, %v297_v30, %v204_v36 }
 0x21e   :  { %v213_v39 = vsel %vm210_vm5, %v212_v37, %v208_v38 }
 0x21f   :  { %v214_v40 = vmul.f32 %v295_v28, %v213_v39 }
 0x221   :  { %v215_v41 = vpack.c.bf16 %v214_v40, %v214_v40 }
 0x223   :  { %216 = vst [vmem:[#allocation8] sm:$0xf] %v215_v41 }
 0x224   :  { %227 = dma.vmem_to_hbm [thread:$0]  %s223_s4, 64, %s225_s13, [#allocation4]  }
 0x225   :  { %398 = dma.done.wait [#allocation4], 64  }
 0x226   :  { %399 = vsyncadd [#allocation4], 4294967232 }
 0x227   :  { %232 = vsyncpa [#allocation3], 1 }
 0x228   :  { %233 = vsyncpa [#allocation6], 1 }
 0x229   :  { %234 = vsyncpa [#allocation4], 1 }

</bundles_post_ra>
